<compile_context>
chip_gen: v6e
topology: v6e:2x2x1
jax: 0.10.0
libtpu: 0.0.40
codegen_flags: <defaults>
</compile_context>

<pallas_src>
import functools

import jax
import jax.numpy as jnp
from jax.experimental import pallas as pl
from jax.experimental.pallas import tpu as pltpu

_EPS = 1e-5
_VMEM_LIMIT = 48 << 20      # leave headroom on v7x (64 MiB physical VMEM)
_PASS1_BUDGET = 28 << 20    # pipeline-buffer budget for pass-1 (input x2 bufs)
_PASS2_BUDGET = 32 << 20    # pipeline-buffer budget for pass-2 (in+out+scale/shift)


def _choose_tile(length, rows, bytes_per_elem_all_buffers, budget_bytes):
    """Largest lane tile (multiple of 128 when length > 128) fitting the budget."""
    if length <= 128:
        return int(length)                           # full-extent last dim is legal
    cap = budget_bytes // max(1, rows * bytes_per_elem_all_buffers)
    cap = max(128, (cap // 128) * 128)
    return int(min(cap, (length // 128) * 128))


def _pick_channel_fold(c, hw):
    """Smallest k dividing C with (k*HW) % 128 == 0, keeping >= 8 sublanes; else 1."""
    if hw % 128 == 0 or hw >= 1024:                  # already (nearly) lane-dense
        return 1
    for k in range(2, c + 1):
        if c % k == 0 and (k * hw) % 128 == 0 and (c // k) >= 8:
            return k
    return 1


def _stats_kernel(x_ref, sum_ref, sq_ref, acc_s, acc_q, *, hw, tile, lane_w):
    """Per-(n, channel) sum / sum-of-squares over the hw-tile grid axis."""
    g = pl.program_id(1)

    @pl.when(g == 0)
    def _():
        acc_s[...] = jnp.zeros_like(acc_s)
        acc_q[...] = jnp.zeros_like(acc_q)

    needs_mask = (hw % tile) != 0                    # static Python predicate
    rem = hw - g * tile                              # valid lanes in this block
    for j in range(tile // lane_w):                  # static, lane-aligned slices
        v = x_ref[:, j * lane_w:(j + 1) * lane_w].astype(jnp.float32)
        if needs_mask:
            lane = jax.lax.broadcasted_iota(jnp.int32, v.shape, 1) + j * lane_w
            v = jnp.where(lane < rem, v, 0.0)        # zero garbage tail lanes
        acc_s[...] += v                              # lane-parallel VPU adds
        acc_q[...] += v * v

    @pl.when(g == pl.num_programs(1) - 1)            # one XLU reduce + store per n
    def _():
        sum_ref[...] = jnp.sum(acc_s[...], axis=-1, keepdims=True)
        sq_ref[...] = jnp.sum(acc_q[...], axis=-1, keepdims=True)


def _normalize_kernel(x_ref, scale_ref, shift_ref, o_ref):
    """y = x * scale + shift (scale/shift broadcast along lanes or pre-expanded)."""
    x = x_ref[...].astype(scale_ref.dtype)
    o_ref[...] = (x * scale_ref[...] + shift_ref[...]).astype(o_ref.dtype)


@jax.jit
def batchnorm2d_pallas(x_nchw, gamma, beta):
    """Training-mode BatchNorm2d forward on an NCHW tensor."""
    N, C, H, W = x_nchw.shape
    HW = H * W
    itemsize = x_nchw.dtype.itemsize
    x3 = x_nchw.reshape(N, C, HW)                    # free view (no transpose)

    # ---------------- Pass 1: per-(n, channel) sum / sum-of-squares ----------
    T1 = _choose_tile(HW, C, 2 * itemsize, _PASS1_BUDGET)   # input double-buffered
    LW = 128 if T1 >= 128 else T1
    G1 = pl.cdiv(HW, T1)

    s, sq = pl.pallas_call(
        functools.partial(_stats_kernel, hw=HW, tile=T1, lane_w=LW),
        out_shape=(jax.ShapeDtypeStruct((N, C, 1), jnp.float32),
                   jax.ShapeDtypeStruct((N, C, 1), jnp.float32)),
        grid=(N, G1),
        in_specs=[pl.BlockSpec((None, C, T1), lambda n, g: (n, 0, g))],
        out_specs=(pl.BlockSpec((None, C, 1), lambda n, g: (n, 0, 0)),
                   pl.BlockSpec((None, C, 1), lambda n, g: (n, 0, 0))),
        scratch_shapes=[pltpu.VMEM((C, LW), jnp.float32),
                        pltpu.VMEM((C, LW), jnp.float32)],
        compiler_params=pltpu.CompilerParams(
            dimension_semantics=("parallel", "arbitrary"),
            vmem_limit_bytes=_VMEM_LIMIT),
    )(x3)

    # ---------------- O(C) fold in plain JAX ---------------------------------
    # TODO(synk): E[x^2]-mean^2 in f32 is cancellation-prone when |mean| >> std
    # at very large N*HW; subtract a per-channel baseline before accumulating if
    # tighter accuracy is ever needed.
    cnt = jnp.float32(N * HW)
    s_tot = jnp.sum(s, axis=0)[:, 0]                              # (C,)
    q_tot = jnp.sum(sq, axis=0)[:, 0]                             # (C,)
    mean = s_tot / cnt
    var = jnp.maximum(q_tot / cnt - mean * mean, 0.0)             # biased variance
    inv = jax.lax.rsqrt(var + _EPS)
    scale = gamma.astype(jnp.float32) * inv                       # (C,)
    shift = beta.astype(jnp.float32) - mean * scale               # (C,)
    cdt = jnp.bfloat16 if x_nchw.dtype == jnp.bfloat16 else jnp.float32
    cdt_size = jnp.dtype(cdt).itemsize

    # ---------------- Pass 2: y = x * scale + shift --------------------------
    k = _pick_channel_fold(C, HW)

    if k == 1:
        T2 = _choose_tile(HW, C, 4 * itemsize, _PASS2_BUDGET)     # x + y, 2 bufs each
        G2 = pl.cdiv(HW, T2)
        x_spec = pl.BlockSpec((None, C, T2), lambda n, g: (n, 0, g))
        y3 = pl.pallas_call(
            _normalize_kernel,
            out_shape=jax.ShapeDtypeStruct((N, C, HW), x_nchw.dtype),
            grid=(N, G2),
            in_specs=[x_spec,
                      pl.BlockSpec((C, 1), lambda n, g: (0, 0)),
                      pl.BlockSpec((C, 1), lambda n, g: (0, 0))],
            out_specs=x_spec,
            # TODO(synk): add input_output_aliases={0: 0} (with x donated at the
            # jit boundary) when the caller no longer needs x, to halve peak
            # activation memory.
            compiler_params=pltpu.CompilerParams(
                dimension_semantics=("parallel", "parallel"),
                vmem_limit_bytes=_VMEM_LIMIT),
        )(x3, scale.reshape(C, 1).astype(cdt), shift.reshape(C, 1).astype(cdt))
        return y3.reshape(N, C, H, W)

    # Channel-folded path for small / non-lane-dense HW (e.g. 7x7, 14x14 maps).
    Ck, F = C // k, k * HW
    x2 = x_nchw.reshape(N, Ck, F)                                 # still a free view
    scale_f = jnp.broadcast_to(scale.reshape(Ck, k, 1), (Ck, k, HW)).reshape(Ck, F)
    shift_f = jnp.broadcast_to(shift.reshape(Ck, k, 1), (Ck, k, HW)).reshape(Ck, F)
    T2 = _choose_tile(F, Ck, 4 * itemsize + 4 * cdt_size, _PASS2_BUDGET)
    G2 = pl.cdiv(F, T2)
    x_spec = pl.BlockSpec((None, Ck, T2), lambda g, n: (n, 0, g))
    cs_spec = pl.BlockSpec((Ck, T2), lambda g, n: (0, g))   # resident across inner n
    y2 = pl.pallas_call(
        _normalize_kernel,
        out_shape=jax.ShapeDtypeStruct((N, Ck, F), x_nchw.dtype),
        grid=(G2, N),                        # n innermost -> scale/shift stay resident
        in_specs=[x_spec, cs_spec, cs_spec],
        out_specs=x_spec,
        compiler_params=pltpu.CompilerParams(
            dimension_semantics=("parallel", "parallel"),
            vmem_limit_bytes=_VMEM_LIMIT),
    )(x2, scale_f.astype(cdt), shift_f.astype(cdt))
    return y2.reshape(N, C, H, W)


def switchable_batchnorm2d(x_nchw, gammas, betas, width_mult_list):
    """Mirrors SwitchableBatchNorm2d.forward: pick bn[idx], then apply it."""
    width_mult = max(width_mult_list)
    idx = width_mult_list.index(width_mult) + 1      # exact module semantics
    gamma, beta = gammas[idx], betas[idx]
    C = x_nchw.shape[1]
    if gamma.shape != (C,) or beta.shape != (C,):
        raise ValueError(
            f"Selected bn[{idx}] has {gamma.shape[0]} features but input has "
            f"{C} channels; check width_mult_list / num_features_list.")
    return batchnorm2d_pallas(x_nchw, gamma, beta)


def _reference_bn(x_nchw, gamma, beta, eps=_EPS):
    mean = jnp.mean(x_nchw, axis=(0, 2, 3), keepdims=True)
    var = jnp.mean((x_nchw - mean) ** 2, axis=(0, 2, 3), keepdims=True)
    g = gamma.reshape(1, -1, 1, 1)
    b = beta.reshape(1, -1, 1, 1)
    return (x_nchw - mean) * jax.lax.rsqrt(var + eps) * g + b


if __name__ == "__main__":
    # Synthetic "config" replacing snn_models/<model_name>.json
    width_mult_list = [1.0]           # => idx = 0 + 1 = 1
    num_features_list = [2, 4]        # bn[1] has num_features = 4 == C

    key = jax.random.PRNGKey(0)
    kx, *kparams = jax.random.split(key, 1 + 2 * len(num_features_list))

    N, C, H, W = 2, 4, 16, 16
    x = jax.random.normal(kx, (N, C, H, W), dtype=jnp.float32)

    # Deterministic per-BN affine parameters (one (gamma, beta) per entry).
    gammas, betas = [], []
    for i, nf in enumerate(num_features_list):
        gammas.append(jax.random.normal(kparams[2 * i], (nf,), jnp.float32) * 0.1 + 1.0)
        betas.append(jax.random.normal(kparams[2 * i + 1], (nf,), jnp.float32) * 0.1)
    # TODO(synk): running_mean/running_var EMA updates (training-side buffers)
    # are not modeled; only the forward normalization path is implemented.

    y = switchable_batchnorm2d(x, gammas, betas, width_mult_list)
    y = jax.block_until_ready(y)

    idx = width_mult_list.index(max(width_mult_list)) + 1
    y_ref = _reference_bn(x, gammas[idx], betas[idx])
    assert y.shape == x.shape and y.dtype == x.dtype
    assert jnp.max(jnp.abs(y - y_ref)) < 1e-4

    print("KERNEL_OK")
</pallas_src>

<mosaic_0001>
module attributes {stable_mosaic.version = 11 : i64} {
  func.func @_stats_kernel(%arg0: i32, %arg1: i32, %arg2: memref<1x4x256xf32, #tpu.memory_space<vmem>>, %arg3: memref<1x4x1xf32, #tpu.memory_space<vmem>>, %arg4: memref<1x4x1xf32, #tpu.memory_space<vmem>>, %arg5: memref<4x128xf32, #tpu.memory_space<vmem>>, %arg6: memref<4x128xf32, #tpu.memory_space<vmem>>) attributes {dimension_semantics = [#tpu.dimension_semantics<parallel>, #tpu.dimension_semantics<arbitrary>], iteration_bounds = array<i64: 2, 1>, scalar_prefetch = 0 : i64, scratch_operands = 2 : i64, tpu.core_type = #tpu.core_type<tc>, window_params = [{transform_indices = @transform_0, window_bounds = array<i64: 1, 4, 256>}, {transform_indices = @transform_1, window_bounds = array<i64: 1, 4, 1>}, {transform_indices = @transform_2, window_bounds = array<i64: 1, 4, 1>}]} {
    %c0_i32 = arith.constant 0 : i32
    %0 = arith.cmpi eq, %arg1, %c0_i32 : i32
    %1 = arith.extui %0 : i1 to i32
    %c0_i32_0 = arith.constant 0 : i32
    %2 = arith.cmpi ne, %1, %c0_i32_0 : i32
    scf.if %2 {
      %cst = arith.constant 0.000000e+00 : f32
      %24 = vector.broadcast %cst : f32 to vector<4x128xf32>
      %c0_23 = arith.constant 0 : index
      %c0_24 = arith.constant 0 : index
      %25 = vector.load %arg5[%c0_23, %c0_24] : memref<4x128xf32, #tpu.memory_space<vmem>>, vector<4x128xf32>
      tpu.vector_store %arg5[%c0_23, %c0_24], %24 {strides = array<i32>} : memref<4x128xf32, #tpu.memory_space<vmem>>, vector<4x128xf32>,
      %cst_25 = arith.constant 0.000000e+00 : f32
      %26 = vector.broadcast %cst_25 : f32 to vector<4x128xf32>
      %c0_26 = arith.constant 0 : index
      %c0_27 = arith.constant 0 : index
      %27 = vector.load %arg6[%c0_26, %c0_27] : memref<4x128xf32, #tpu.memory_space<vmem>>, vector<4x128xf32>
      tpu.vector_store %arg6[%c0_26, %c0_27], %26 {strides = array<i32>} : memref<4x128xf32, #tpu.memory_space<vmem>>, vector<4x128xf32>,
    } else {
    }
    %c0 = arith.constant 0 : index
    %c0_1 = arith.constant 0 : index
    %c0_2 = arith.constant 0 : index
    %3 = vector.load %arg2[%c0, %c0_1, %c0_2] : memref<1x4x256xf32, #tpu.memory_space<vmem>>, vector<1x4x128xf32>
    %4 = vector.shape_cast %3 : vector<1x4x128xf32> to vector<4x128xf32>
    %c0_3 = arith.constant 0 : index
    %c0_4 = arith.constant 0 : index
    %5 = vector.load %arg5[%c0_3, %c0_4] : memref<4x128xf32, #tpu.memory_space<vmem>>, vector<4x128xf32>
    %6 = arith.addf %5, %4 : vector<4x128xf32>
    %c0_5 = arith.constant 0 : index
    %c0_6 = arith.constant 0 : index
    %7 = vector.load %arg5[%c0_5, %c0_6] : memref<4x128xf32, #tpu.memory_space<vmem>>, vector<4x128xf32>
    tpu.vector_store %arg5[%c0_5, %c0_6], %6 {strides = array<i32>} : memref<4x128xf32, #tpu.memory_space<vmem>>, vector<4x128xf32>,
    %c0_7 = arith.constant 0 : index
    %c0_8 = arith.constant 0 : index
    %8 = vector.load %arg6[%c0_7, %c0_8] : memref<4x128xf32, #tpu.memory_space<vmem>>, vector<4x128xf32>
    %9 = arith.mulf %4, %4 : vector<4x128xf32>
    %10 = arith.addf %8, %9 : vector<4x128xf32>
    %c0_9 = arith.constant 0 : index
    %c0_10 = arith.constant 0 : index
    %11 = vector.load %arg6[%c0_9, %c0_10] : memref<4x128xf32, #tpu.memory_space<vmem>>, vector<4x128xf32>
    tpu.vector_store %arg6[%c0_9, %c0_10], %10 {strides = array<i32>} : memref<4x128xf32, #tpu.memory_space<vmem>>, vector<4x128xf32>,
    %c0_11 = arith.constant 0 : index
    %c0_12 = arith.constant 0 : index
    %c128 = arith.constant 128 : index
    %12 = vector.load %arg2[%c0_11, %c0_12, %c128] : memref<1x4x256xf32, #tpu.memory_space<vmem>>, vector<1x4x128xf32>
    %13 = vector.shape_cast %12 : vector<1x4x128xf32> to vector<4x128xf32>
    %c0_13 = arith.constant 0 : index
    %c0_14 = arith.constant 0 : index
    %14 = vector.load %arg5[%c0_13, %c0_14] : memref<4x128xf32, #tpu.memory_space<vmem>>, vector<4x128xf32>
    %15 = arith.addf %14, %13 : vector<4x128xf32>
    %c0_15 = arith.constant 0 : index
    %c0_16 = arith.constant 0 : index
    %16 = vector.load %arg5[%c0_15, %c0_16] : memref<4x128xf32, #tpu.memory_space<vmem>>, vector<4x128xf32>
    tpu.vector_store %arg5[%c0_15, %c0_16], %15 {strides = array<i32>} : memref<4x128xf32, #tpu.memory_space<vmem>>, vector<4x128xf32>,
    %c0_17 = arith.constant 0 : index
    %c0_18 = arith.constant 0 : index
    %17 = vector.load %arg6[%c0_17, %c0_18] : memref<4x128xf32, #tpu.memory_space<vmem>>, vector<4x128xf32>
    %18 = arith.mulf %13, %13 : vector<4x128xf32>
    %19 = arith.addf %17, %18 : vector<4x128xf32>
    %c0_19 = arith.constant 0 : index
    %c0_20 = arith.constant 0 : index
    %20 = vector.load %arg6[%c0_19, %c0_20] : memref<4x128xf32, #tpu.memory_space<vmem>>, vector<4x128xf32>
    tpu.vector_store %arg6[%c0_19, %c0_20], %19 {strides = array<i32>} : memref<4x128xf32, #tpu.memory_space<vmem>>, vector<4x128xf32>,
    %c0_i32_21 = arith.constant 0 : i32
    %21 = arith.cmpi eq, %arg1, %c0_i32_21 : i32
    %22 = arith.extui %21 : i1 to i32
    %c0_i32_22 = arith.constant 0 : i32
    %23 = arith.cmpi ne, %22, %c0_i32_22 : i32
    scf.if %23 {
      %c0_23 = arith.constant 0 : index
      %c0_24 = arith.constant 0 : index
      %24 = vector.load %arg5[%c0_23, %c0_24] : memref<4x128xf32, #tpu.memory_space<vmem>>, vector<4x128xf32>
      %cst = arith.constant dense<0.000000e+00> : vector<4xf32>
      %25 = vector.multi_reduction <add>, %24, %cst [1] : vector<4x128xf32> to vector<4xf32>
      %26 = vector.shape_cast %25 : vector<4xf32> to vector<4x1xf32>
      %c0_25 = arith.constant 0 : index
      %c0_26 = arith.constant 0 : index
      %c0_27 = arith.constant 0 : index
      %27 = vector.load %arg3[%c0_25, %c0_26, %c0_27] : memref<1x4x1xf32, #tpu.memory_space<vmem>>, vector<1x4x1xf32>
      %28 = vector.shape_cast %27 : vector<1x4x1xf32> to vector<4x1xf32>
      %29 = vector.shape_cast %26 : vector<4x1xf32> to vector<1x4x1xf32>
      tpu.vector_store %arg3[%c0_25, %c0_26, %c0_27], %29 {strides = array<i32>} : memref<1x4x1xf32, #tpu.memory_space<vmem>>, vector<1x4x1xf32>,
      %c0_28 = arith.constant 0 : index
      %c0_29 = arith.constant 0 : index
      %30 = vector.load %arg6[%c0_28, %c0_29] : memref<4x128xf32, #tpu.memory_space<vmem>>, vector<4x128xf32>
      %cst_30 = arith.constant dense<0.000000e+00> : vector<4xf32>
      %31 = vector.multi_reduction <add>, %30, %cst_30 [1] : vector<4x128xf32> to vector<4xf32>
      %32 = vector.shape_cast %31 : vector<4xf32> to vector<4x1xf32>
      %c0_31 = arith.constant 0 : index
      %c0_32 = arith.constant 0 : index
      %c0_33 = arith.constant 0 : index
      %33 = vector.load %arg4[%c0_31, %c0_32, %c0_33] : memref<1x4x1xf32, #tpu.memory_space<vmem>>, vector<1x4x1xf32>
      %34 = vector.shape_cast %33 : vector<1x4x1xf32> to vector<4x1xf32>
      %35 = vector.shape_cast %32 : vector<4x1xf32> to vector<1x4x1xf32>
      tpu.vector_store %arg4[%c0_31, %c0_32, %c0_33], %35 {strides = array<i32>} : memref<1x4x1xf32, #tpu.memory_space<vmem>>, vector<1x4x1xf32>,
    } else {
    }
    return
  }
  func.func @transform_0(%arg0: i32, %arg1: i32) -> (i32, i32, i32) {
    %c0_i32 = arith.constant 0 : i32
    %c0_i32_0 = arith.constant 0 : i32
    return %arg0, %c0_i32, %arg1 : i32, i32, i32
  }
  func.func @transform_1(%arg0: i32, %arg1: i32) -> (i32, i32, i32) {
    %c0_i32 = arith.constant 0 : i32
    %c0_i32_0 = arith.constant 0 : i32
    %c0_i32_1 = arith.constant 0 : i32
    return %arg0, %c0_i32, %c0_i32_0 : i32, i32, i32
  }
  func.func @transform_2(%arg0: i32, %arg1: i32) -> (i32, i32, i32) {
    %c0_i32 = arith.constant 0 : i32
    %c0_i32_0 = arith.constant 0 : i32
    %c0_i32_1 = arith.constant 0 : i32
    return %arg0, %c0_i32, %c0_i32_0 : i32, i32, i32
  }
}

module attributes {stable_mosaic.version = 11 : i64} {
  func.func @_normalize_kernel(%arg0: i32, %arg1: i32, %arg2: memref<1x4x256xf32, #tpu.memory_space<vmem>>, %arg3: memref<4x1xf32, #tpu.memory_space<vmem>>, %arg4: memref<4x1xf32, #tpu.memory_space<vmem>>, %arg5: memref<1x4x256xf32, #tpu.memory_space<vmem>>) attributes {dimension_semantics = [#tpu.dimension_semantics<parallel>, #tpu.dimension_semantics<parallel>], iteration_bounds = array<i64: 2, 1>, scalar_prefetch = 0 : i64, scratch_operands = 0 : i64, tpu.core_type = #tpu.core_type<tc>, window_params = [{transform_indices = @transform_0, window_bounds = array<i64: 1, 4, 256>}, {pipeline_mode = #tpu.pipeline_mode<synchronous>, transform_indices = @transform_1, window_bounds = array<i64: 4, 1>}, {pipeline_mode = #tpu.pipeline_mode<synchronous>, transform_indices = @transform_2, window_bounds = array<i64: 4, 1>}, {transform_indices = @transform_3, window_bounds = array<i64: 1, 4, 256>}]} {
    %c0 = arith.constant 0 : index
    %c0_0 = arith.constant 0 : index
    %c0_1 = arith.constant 0 : index
    %0 = vector.load %arg2[%c0, %c0_0, %c0_1] : memref<1x4x256xf32, #tpu.memory_space<vmem>>, vector<1x4x256xf32>
    %1 = vector.shape_cast %0 : vector<1x4x256xf32> to vector<4x256xf32>
    %c0_2 = arith.constant 0 : index
    %c0_3 = arith.constant 0 : index
    %2 = vector.load %arg3[%c0_2, %c0_3] : memref<4x1xf32, #tpu.memory_space<vmem>>, vector<4x1xf32>
    %3 = vector.broadcast %2 : vector<4x1xf32> to vector<4x256xf32>
    %4 = arith.mulf %1, %3 : vector<4x256xf32>
    %c0_4 = arith.constant 0 : index
    %c0_5 = arith.constant 0 : index
    %5 = vector.load %arg4[%c0_4, %c0_5] : memref<4x1xf32, #tpu.memory_space<vmem>>, vector<4x1xf32>
    %6 = vector.broadcast %5 : vector<4x1xf32> to vector<4x256xf32>
    %7 = arith.addf %4, %6 : vector<4x256xf32>
    %c0_6 = arith.constant 0 : index
    %c0_7 = arith.constant 0 : index
    %c0_8 = arith.constant 0 : index
    %8 = vector.load %arg5[%c0_6, %c0_7, %c0_8] : memref<1x4x256xf32, #tpu.memory_space<vmem>>, vector<1x4x256xf32>
    %9 = vector.shape_cast %8 : vector<1x4x256xf32> to vector<4x256xf32>
    %10 = vector.shape_cast %7 : vector<4x256xf32> to vector<1x4x256xf32>
    tpu.vector_store %arg5[%c0_6, %c0_7, %c0_8], %10 {strides = array<i32>} : memref<1x4x256xf32, #tpu.memory_space<vmem>>, vector<1x4x256xf32>,
    return
  }
  func.func @transform_0(%arg0: i32, %arg1: i32) -> (i32, i32, i32) {
    %c0_i32 = arith.constant 0 : i32
    %c0_i32_0 = arith.constant 0 : i32
    return %arg0, %c0_i32, %arg1 : i32, i32, i32
  }
  func.func @transform_1(%arg0: i32, %arg1: i32) -> (i32, i32) {
    %c0_i32 = arith.constant 0 : i32
    %c0_i32_0 = arith.constant 0 : i32
    %c0_i32_1 = arith.constant 0 : i32
    return %c0_i32, %c0_i32_0 : i32, i32
  }
  func.func @transform_2(%arg0: i32, %arg1: i32) -> (i32, i32) {
    %c0_i32 = arith.constant 0 : i32
    %c0_i32_0 = arith.constant 0 : i32
    %c0_i32_1 = arith.constant 0 : i32
    return %c0_i32, %c0_i32_0 : i32, i32
  }
  func.func @transform_3(%arg0: i32, %arg1: i32) -> (i32, i32, i32) {
    %c0_i32 = arith.constant 0 : i32
    %c0_i32_0 = arith.constant 0 : i32
    return %arg0, %c0_i32, %arg1 : i32, i32, i32
  }
}

</mosaic_0001>

<bundles_post_ra>
// kernel: batchnorm2d_pallas.2
= control target key start
LH: loop header
LB: loop body
LE: loop exit
PB: predicated region body
PF: predicated region fallthrough
CT: control target
= control target key end

     0   :  { %s393_s9 = smov 0   ;;  %s395_s10 = smov 0   ;;  %s433_s0 = inlined_call_operand.vmem [shape: f32[2,4,256], index: 0, kind: input, shape index: {}]   ;;  %s434_s1 = inlined_call_operand.vmem [shape: f32[2,4,1], index: 1, kind: output, shape index: {0}]   ;;  %s435_s2 = inlined_call_operand.vmem [shape: f32[2,4,1], index: 2, kind: output, shape index: {1}]  }
   0x1   :  { %s397_s11 = smov 0  }
   0x2 LB: > { %s25_s12 = sadd.s32 1, %s371_s10  ;;  %p320_p0 = scmp.ge.s32.totalorder %s375_s11, 1  ;;  %s375_s11 = sphi %s397_s11, %s13_s11   ;;  %s371_s10 = sphi %s395_s10, %s437_s10   ;;  %s367_s9 = sphi %s393_s9, %s436_s9  }
   0x3   : > { %p27_p1 = scmp.ge.s32.totalorder %s25_s12, 2  ;;  %p134_p2 = scmp.lt.s32.totalorder %s375_s11, 3 }
   0x5   : > { %s439_s12 = smov (%p27_p1, %s25_s12), 0  ;;  %p135_p3 = pnand %p320_p0, %p134_p2 }
   0x6   : > { %p164_p4 = scmp.lt.s32.totalorder (!%p135_p3), %s367_s9, 1 }
   0x7   : > { %138 = sbr.rel (%p135_p3) target bundleno = 185 (0xb9), region = 24 }
   0xc   : > { %v377_v0 = vmov 0.0   ;;  %s441_s9 = smov (!%p164_p4, %s367_s9), 1  ;;  %vm207_vm0 = vcmask 1043456   ;;  %vm211_vm1 = vcmask 3072  }
   0xd   : > { %185 = vst [vmem:[#allocation2] sm:$0xf] %v377_v0  ;;  %186 = vst [vmem:[#allocation3] sm:$0xf] %v377_v0  ;;  %s327_s13 = sshll.u32 %s441_s9, 3  ;;  %s323_s17 = sshll.u32 %s441_s9, 2 }
   0xe   : > { %s171_s16 = scalar_lea.vmem %s433_s0, %s327_s13  ;;  %s176_s20 = scalar_lea.vmem %s434_s1, %s323_s17 }
   0xf   : > { %v187_v1 = vld [vmem:[%s171_s16] sm:$0xf]  ;;  %v195_v7 = vld [vmem:[%s171_s16 + $0x4] sm:$0xf]  ;;  %s180_s23 = scalar_lea.vmem %s435_s2, %s323_s17 }
  0x10   : > { %v192_v2 = vmul.f32 %v187_v1, %v187_v1  ;;  %v200_v8 = vmul.f32 %v195_v7, %v195_v7 }
  0x14   : > { %v188_v3 = vld [vmem:[#allocation2] sm:$0xf]  ;;  %v191_v4 = vld [vmem:[#allocation3] sm:$0xf] }
  0x15   : > { %v189_v5 = vadd.f32 %v188_v3, %v187_v1  ;;  %v193_v6 = vadd.f32 %v192_v2, %v191_v4 }
  0x17   : > { %190 = vst [vmem:[#allocation2] sm:$0xf] %v189_v5  ;;  %194 = vst [vmem:[#allocation3] sm:$0xf] %v193_v6 }
  0x1e   : > { %v196_v9 = vld [vmem:[#allocation2] sm:$0xf]  ;;  %v199_v10 = vld [vmem:[#allocation3] sm:$0xf] }
  0x1f   : > { %v197_v11 = vadd.f32 %v196_v9, %v195_v7  ;;  %v201_v12 = vadd.f32 %v200_v8, %v199_v10 }
  0x21   : > { %198 = vst [vmem:[#allocation2] sm:$0xf] %v197_v11  ;;  %202 = vst [vmem:[#allocation3] sm:$0xf] %v201_v12 }
  0x28   : > { %v206_v13 = vld [vmem:[#allocation2] sm:$0xf]  ;;  %v213_v14 = vld [vmem:[#allocation3] sm:$0xf] }
  0x29   : > { %v208_v15 = vsel %vm207_vm0, %v206_v13, 0.0  ;;  %v214_v16 = vsel %vm207_vm0, %v213_v14, 0.0 }
  0x2a   : > { %209 = vadd.xlane.f32.xlu0 %v208_v15 }
  0x2e   : > { %215 = vadd.xlane.f32.xlu0 %v214_v16 }
  0xb3   : > { %v210_v17 = vpop.xlane.xlu0 %209 }
  0xb4   : > { %212 = vst.msk [vmem:[%s176_s20] sm:$0xf] %vm211_vm1, %v210_v17 }
  0xb7   : > { %v216_v18 = vpop.xlane.xlu0 %215 }
  0xb8   : > { %217 = vst.msk [vmem:[%s180_s23] sm:$0xf] %vm211_vm1, %v216_v18 }
  0xb9 PF: > { %s13_s11 = sadd.s32 1, %s375_s11   ;;  %s436_s9 = smov %s371_s10 }
  0xba   : > { %p10_p5 = scmp.ge.s32.totalorder %s13_s11, 4   ;;  %s437_s10 = smov %s439_s12 }
  0xbc   :  { %12 = sbr.rel (!%p10_p5) target bundleno = 2 (0x2), region = 74 }

// kernel: batchnorm2d_pallas.3
= control target key start
LH: loop header
LB: loop body
LE: loop exit
PB: predicated region body
PF: predicated region fallthrough
CT: control target
= control target key end

     0   :  { %s413_s12 = smov 0   ;;  %s415_s13 = smov 0   ;;  %s452_s0 = inlined_call_operand.vmem [shape: f32[2,4,256], index: 0, kind: input, shape index: {}]   ;;  %s453_s1 = inlined_call_operand.vmem [shape: f32[4,1], index: 1, kind: input, shape index: {}]   ;;  %s454_s2 = inlined_call_operand.vmem [shape: f32[4,1], index: 2, kind: input, shape index: {}]   ;;  %s455_s3 = inlined_call_operand.vmem [shape: f32[2,4,256], index: 3, kind: output, shape index: {}]  }
   0x1   :  { %s417_s14 = smov 0  }
   0x2 LB: > { %s25_s15 = sadd.s32 1, %s385_s13  ;;  %p331_p0 = scmp.ge.s32.totalorder %s389_s14, 1  ;;  %s389_s14 = sphi %s417_s14, %s13_s14   ;;  %s385_s13 = sphi %s415_s13, %s457_s13   ;;  %s381_s12 = sphi %s413_s12, %s456_s12  }
   0x3   : > { %p27_p1 = scmp.ge.s32.totalorder %s25_s15, 2  ;;  %p158_p2 = scmp.lt.s32.totalorder %s389_s14, 3 }
   0x5   : > { %s459_s15 = smov (%p27_p1, %s25_s15), 0  ;;  %p159_p3 = pnand %p331_p0, %p158_p2 }
   0x6   : > { %p191_p4 = scmp.lt.s32.totalorder (!%p159_p3), %s381_s12, 1 }
   0x7   : > { %162 = sbr.rel (%p159_p3) target bundleno = 147 (0x93), region = 32 }
   0xc   : > { %v211_v0 = vld [vmem:[%s453_s1] sm:$0xf]  ;;  %v391_v1 = vmov 0   ;;  %v392_v3 = vmov 839922192   ;;  %v219_v5 = vlaneseq  ;;  %s461_s12 = smov (!%p191_p4, %s381_s12), 1 }
   0xd   : > { %366 = vset.pattern.permute.xlu0 %v391_v1  ;;  %v225_v2 = vld [vmem:[%s454_s2] sm:$0xf]  ;;  %v217_v4 = vunpack.c.l.s4 %v392_v3  ;;  %s338_s20 = sshll.u32 %s461_s12, 3 }
   0xe   : > { %214 = vperm.xlu0 %366, %v211_v0   ;;  %v220_v7 = vshrl.u32 %v219_v5, 7  ;;  %s198_s23 = scalar_lea.vmem %s452_s0, %s338_s20  ;;  %s208_s26 = scalar_lea.vmem %s455_s3, %s338_s20 }
   0xf   : > { %v218_v6 = vunpack.c.0.s8 %v217_v4  ;;  %v210_v11 = vld [vmem:[%s198_s23] sm:$0xff] }
  0x11   : > { %v221_v8 = vsub.s32 %v218_v6, %v220_v7 }
  0x12   : > { %228 = vperm.xlu0 %366, %v225_v2  }
  0x89   : > { %v215_v9 = vpop.permute.xlu0 %214 }
  0x8a   : > { %v222_v10 = vrot.slane %v215_v9, %v221_v8 }
  0x8c   : > { %v224_v13 = vmul.f32 %v222_v10, %v210_v11 }
  0x8d   : > { %v229_v12 = vpop.permute.xlu0 %228 }
  0x8e   : > { %v236_v14 = vrot.slane %v229_v12, %v221_v8 }
  0x90   : > { %v238_v15 = vadd.f32 %v236_v14, %v224_v13 }
  0x92   : > { %239 = vst [vmem:[%s208_s26] sm:$0xff] %v238_v15 }
  0x93 PF: > { %s13_s14 = sadd.s32 1, %s389_s14   ;;  %s456_s12 = smov %s385_s13 }
  0x94   : > { %p10_p5 = scmp.ge.s32.totalorder %s13_s14, 4   ;;  %s457_s13 = smov %s459_s15 }
  0x96   :  { %12 = sbr.rel (!%p10_p5) target bundleno = 2 (0x2), region = 62 }

</bundles_post_ra>
